<compile_context>
chip_gen: v6e
topology: v6e:2x2x1
jax: 0.10.0
libtpu: 0.0.40
codegen_flags: <defaults>
</compile_context>

<pallas_src>
import functools

import jax
import jax.numpy as jnp
from jax.experimental import pallas as pl
from jax.experimental.pallas import tpu as pltpu

LANE = 128


def _round_up(n: int, m: int) -> int:
    return ((n + m - 1) // m) * m


def decoder_double_out_kernel(h_ref, e_ref, c_ref, w_ref, b_ref, o_ref, x_sc,
                              *, h_dim, e_dim, c_dim, d_dim):
    # --- pack [h | e | c | 0-pad] into the lane-padded f32 slab (VMEM scratch).
    # Static-slice stores at lane offsets 0 / h / h+e; padding lanes stay zero.
    x_sc[...] = jnp.zeros_like(x_sc)
    x_sc[:, 0:h_dim] = h_ref[...]
    x_sc[:, h_dim:h_dim + e_dim] = e_ref[...]
    x_sc[:, h_dim + e_dim:h_dim + e_dim + c_dim] = c_ref[...]

    # --- single fused MXU pass: (B, 128) bf16 @ (128, 128) bf16 -> f32 acc.
    acc = jnp.dot(x_sc[...].astype(jnp.bfloat16), w_ref[...],
                  preferred_element_type=jnp.float32)

    # --- exact f32 bias add on the (idle) VPU; write true-width (B, D) output.
    o_ref[...] = acc[:, :d_dim] + b_ref[...]


def pack_weights(wh_t, we_t, wc_t):
    """Stack the three (in, out) weight matrices row-wise and zero-pad to one
    (128, 128) bf16 slab.  Done once at parameter-init time (not per call)."""
    d = wh_t.shape[1]
    w = jnp.concatenate([wh_t, we_t, wc_t], axis=0)            # (K, D), K = H+E+C
    k = w.shape[0]
    kp, dp = _round_up(k, LANE), _round_up(d, LANE)
    w = jnp.pad(w, ((0, kp - k), (0, dp - d)))
    return w.astype(jnp.bfloat16)


def decoder_double_out(hidden_s, input_encoded, context, packed_w, bias_row):
    """hidden_s: (B, H) f32, input_encoded: (B, E) f32, context: (B, C) f32,
       packed_w: (128, 128) bf16 from pack_weights, bias_row: (1, D) f32.
       Returns (B, D) f32."""
    b, h_dim = hidden_s.shape
    e_dim = input_encoded.shape[1]
    c_dim = context.shape[1]
    d_dim = bias_row.shape[1]
    kp = packed_w.shape[0]
    k = h_dim + e_dim + c_dim

    kernel = functools.partial(
        decoder_double_out_kernel,
        h_dim=h_dim, e_dim=e_dim, c_dim=c_dim, d_dim=d_dim)

    # Un-padded (real) work, per perf review.
    flops = 2 * b * k * d_dim + b * d_dim
    bytes_accessed = (b * k * 4            # three f32 activation inputs
                      + packed_w.size * 2  # bf16 weight slab
                      + d_dim * 4          # f32 bias
                      + b * d_dim * 4)     # f32 output

    return pl.pallas_call(
        kernel,
        out_shape=jax.ShapeDtypeStruct((b, d_dim), jnp.float32),
        in_specs=[pl.BlockSpec(memory_space=pltpu.MemorySpace.VMEM)] * 5,
        out_specs=pl.BlockSpec(memory_space=pltpu.MemorySpace.VMEM),
        scratch_shapes=[pltpu.VMEM((b, kp), jnp.float32)],
        cost_estimate=pl.CostEstimate(
            flops=flops, transcendentals=0, bytes_accessed=bytes_accessed),
    )(hidden_s, input_encoded, context, packed_w, bias_row)


if __name__ == "__main__":
    # Module hyperparameters (small, consistent with the forward pass).
    hidden_size = 32
    embedding_size = 16
    context_size = 24
    double_last_hidden_size = 64
    batch = 8

    key = jax.random.PRNGKey(0)
    k = jax.random.split(key, 7)

    # Deterministic synthetic parameters.  PyTorch nn.Linear stores weight as
    # (out, in); we keep the transposed (in, out) layout for x @ W.
    wh_t = jax.random.normal(k[0], (hidden_size, double_last_hidden_size), jnp.float32) * 0.1
    we_t = jax.random.normal(k[1], (embedding_size, double_last_hidden_size), jnp.float32) * 0.1
    wc_t = jax.random.normal(k[2], (context_size, double_last_hidden_size), jnp.float32) * 0.1
    bias = jax.random.normal(k[3], (double_last_hidden_size,), jnp.float32)

    hidden_s = jax.random.normal(k[4], (batch, hidden_size), jnp.float32)
    input_encoded = jax.random.normal(k[5], (batch, embedding_size), jnp.float32)
    context = jax.random.normal(k[6], (batch, context_size), jnp.float32)

    # One-time parameter packing (init-time, not per-call).
    packed_w = pack_weights(wh_t, we_t, wc_t)
    bias_row = bias.reshape(1, double_last_hidden_size)

    fwd = jax.jit(decoder_double_out)
    out = jax.block_until_ready(
        fwd(hidden_s, input_encoded, context, packed_w, bias_row))

    assert out.shape == (batch, double_last_hidden_size)

    # f32 reference (exact PyTorch semantics) -- loose tolerance because the
    # kernel's MXU matmul operands are bf16.
    ref_f32 = hidden_s @ wh_t + input_encoded @ we_t + context @ wc_t + bias
    assert jnp.allclose(out, ref_f32, atol=1e-1, rtol=1e-1), "mismatch vs f32 reference"

    # Tight check against a reference with identical bf16 operand quantization
    # and an exact f32 bias add (matches kernel numerics).
    xb = jnp.concatenate([hidden_s, input_encoded, context], axis=1).astype(jnp.bfloat16)
    wb = jnp.concatenate([wh_t, we_t, wc_t], axis=0).astype(jnp.bfloat16)
    ref_bf16 = xb.astype(jnp.float32) @ wb.astype(jnp.float32) + bias
    assert jnp.allclose(out, ref_bf16, atol=1e-3, rtol=1e-3), "mismatch vs bf16 reference"

    print("KERNEL_OK")
</pallas_src>

<mosaic_0001>
module attributes {stable_mosaic.version = 11 : i64} {
  func.func @decoder_double_out_kernel(%arg0: memref<8x32xf32, #tpu.memory_space<vmem>>, %arg1: memref<8x16xf32, #tpu.memory_space<vmem>>, %arg2: memref<8x24xf32, #tpu.memory_space<vmem>>, %arg3: memref<128x128xbf16, #tpu.memory_space<vmem>>, %arg4: memref<1x64xf32, #tpu.memory_space<vmem>>, %arg5: memref<8x64xf32, #tpu.memory_space<vmem>>, %arg6: memref<8x128xf32, #tpu.memory_space<vmem>>) attributes {dimension_semantics = [], scalar_prefetch = 0 : i64, scratch_operands = 1 : i64, tpu.core_type = #tpu.core_type<tc>} {
    %cst = arith.constant 0.000000e+00 : f32
    %0 = vector.broadcast %cst : f32 to vector<8x128xf32>
    %c0 = arith.constant 0 : index
    %c0_0 = arith.constant 0 : index
    %1 = vector.load %arg6[%c0, %c0_0] : memref<8x128xf32, #tpu.memory_space<vmem>>, vector<8x128xf32>
    tpu.vector_store %arg6[%c0, %c0_0], %0 {strides = array<i32>} : memref<8x128xf32, #tpu.memory_space<vmem>>, vector<8x128xf32>,
    %c0_1 = arith.constant 0 : index
    %c0_2 = arith.constant 0 : index
    %2 = vector.load %arg0[%c0_1, %c0_2] : memref<8x32xf32, #tpu.memory_space<vmem>>, vector<8x32xf32>
    %c0_3 = arith.constant 0 : index
    %c0_4 = arith.constant 0 : index
    %3 = vector.load %arg6[%c0_3, %c0_4] : memref<8x128xf32, #tpu.memory_space<vmem>>, vector<8x32xf32>
    tpu.vector_store %arg6[%c0_3, %c0_4], %2 {strides = array<i32>} : memref<8x128xf32, #tpu.memory_space<vmem>>, vector<8x32xf32>,
    %c0_5 = arith.constant 0 : index
    %c0_6 = arith.constant 0 : index
    %4 = vector.load %arg1[%c0_5, %c0_6] : memref<8x16xf32, #tpu.memory_space<vmem>>, vector<8x16xf32>
    %c0_7 = arith.constant 0 : index
    %c32 = arith.constant 32 : index
    %5 = vector.load %arg6[%c0_7, %c32] : memref<8x128xf32, #tpu.memory_space<vmem>>, vector<8x16xf32>
    tpu.vector_store %arg6[%c0_7, %c32], %4 {strides = array<i32>} : memref<8x128xf32, #tpu.memory_space<vmem>>, vector<8x16xf32>,
    %c0_8 = arith.constant 0 : index
    %c0_9 = arith.constant 0 : index
    %6 = vector.load %arg2[%c0_8, %c0_9] : memref<8x24xf32, #tpu.memory_space<vmem>>, vector<8x24xf32>
    %c0_10 = arith.constant 0 : index
    %c48 = arith.constant 48 : index
    %7 = vector.load %arg6[%c0_10, %c48] : memref<8x128xf32, #tpu.memory_space<vmem>>, vector<8x24xf32>
    tpu.vector_store %arg6[%c0_10, %c48], %6 {strides = array<i32>} : memref<8x128xf32, #tpu.memory_space<vmem>>, vector<8x24xf32>,
    %c0_11 = arith.constant 0 : index
    %c0_12 = arith.constant 0 : index
    %8 = vector.load %arg6[%c0_11, %c0_12] : memref<8x128xf32, #tpu.memory_space<vmem>>, vector<8x128xf32>
    %9 = arith.truncf %8 : vector<8x128xf32> to vector<8x128xbf16>
    %c0_13 = arith.constant 0 : index
    %c0_14 = arith.constant 0 : index
    %10 = vector.load %arg3[%c0_13, %c0_14] : memref<128x128xbf16, #tpu.memory_space<vmem>>, vector<128x128xbf16>
    %cst_15 = arith.constant dense<0.000000e+00> : vector<8x128xf32>
    %11 = tpu.matmul %9, %10, %cst_15 {dimension_numbers = #tpu.dot_dimension_numbers<[1], [0], [0], [1], [0, 0, 1, 1], [], []>} : vector<8x128xbf16>, vector<128x128xbf16>, vector<8x128xf32> -> vector<8x128xf32>
    %12 = vector.extract_strided_slice %11 {offsets = [0, 0], sizes = [8, 64], strides = [1, 1]} : vector<8x128xf32> to vector<8x64xf32>
    %c0_16 = arith.constant 0 : index
    %c0_17 = arith.constant 0 : index
    %13 = vector.load %arg4[%c0_16, %c0_17] : memref<1x64xf32, #tpu.memory_space<vmem>>, vector<1x64xf32>
    %14 = vector.broadcast %13 : vector<1x64xf32> to vector<8x64xf32>
    %15 = arith.addf %12, %14 : vector<8x64xf32>
    %c0_18 = arith.constant 0 : index
    %c0_19 = arith.constant 0 : index
    %16 = vector.load %arg5[%c0_18, %c0_19] : memref<8x64xf32, #tpu.memory_space<vmem>>, vector<8x64xf32>
    tpu.vector_store %arg5[%c0_18, %c0_19], %15 {strides = array<i32>} : memref<8x64xf32, #tpu.memory_space<vmem>>, vector<8x64xf32>,
    return
  }
}

</mosaic_0001>

<bundles_post_ra>
// kernel: decoder_double_out.1
= control target key start
LH: loop header
LB: loop body
LE: loop exit
PB: predicated region body
PF: predicated region fallthrough
CT: control target
= control target key end

     0   :  { %10 = vsyncpa [#allocation4], 0  ;;  %s446_s0 = inlined_call_operand.hbm [shape: f32[8,32], index: 0, kind: input, shape index: {}]   ;;  %s447_s1 = inlined_call_operand.hbm [shape: f32[8,16], index: 1, kind: input, shape index: {}]   ;;  %s448_s2 = inlined_call_operand.hbm [shape: f32[8,24], index: 2, kind: input, shape index: {}]   ;;  %s449_s3 = inlined_call_operand.hbm [shape: bf16[128,128], index: 3, kind: input, shape index: {}]   ;;  %s450_s4 = inlined_call_operand.vmem [shape: f32[1,64], index: 4, kind: input, shape index: {}]   ;;  %s451_s5 = inlined_call_operand.hbm [shape: f32[8,64], index: 5, kind: output, shape index: {}]  }
   0x1   :  { %11 = vsyncpa [#allocation7], 0 }
   0x2   :  { %12 = vsyncpa [#allocation10], 0 }
   0x3   :  { %13 = vsyncpa [#allocation5], 0  ;;  %s387_s18 = smov [#allocation6]   ;;  %s388_s20 = smov [#allocation3]  }
   0x4   :  { %s30_s19 = sshll.u32 %s387_s18, 4  ;;  %s20_s21 = sshll.u32 %s388_s20, 4  ;;  %s31_s19 = int_to_ptr.vmem [resolvable:$true] %s30_s19  ;;  %s21_s21 = int_to_ptr.vmem [resolvable:$true] %s20_s21 }
   0x5   :  { %s287_s22 = scalar_lea.vmem %s31_s19, 128  ;;  %p292_p1 = scmp.lt.s32.totalorder %s31_s19, %s31_s19 }
   0x6   :  { %p288_p0 = scmp.ne.s32.totalorder %s31_s19, %s287_s22  ;;  %p293_p2 = scmp.lt.s32.totalorder %s287_s22, %s287_s22 }
   0x8   :  { %p294_p3 = por %p293_p2, %p292_p1 }
   0xa   :  { %p295_p4 = pnand %p294_p3, %p288_p0 }
   0xc   :  { %298 = shalt.err (!%p295_p4)
}
   0xd   :  { %33 = dma.hbm_to_vmem [thread:$0]  %s447_s1, 128, %s31_s19, [#allocation7]  }
   0xe   :  { %s307_s25 = scalar_lea.vmem %s21_s21, 128  ;;  %p312_p6 = scmp.lt.s32.totalorder %s21_s21, %s21_s21 }
   0xf   :  { %p308_p5 = scmp.ne.s32.totalorder %s21_s21, %s307_s25  ;;  %p313_p7 = scmp.lt.s32.totalorder %s307_s25, %s307_s25 }
  0x11   :  { %p314_p8 = por %p313_p7, %p312_p6 }
  0x13   :  { %p315_p9 = pnand %p314_p8, %p308_p5 }
  0x15   :  { %318 = shalt.err (!%p315_p9)
}
  0x16   :  { %23 = dma.hbm_to_vmem [thread:$0]  %s446_s0, 128, %s21_s21, [#allocation4]  }
  0x17   :  { %s389_s28 = smov [#allocation8]   ;;  %s390_s30 = smov [#allocation9]  }
  0x18   :  { %s40_s29 = sshll.u32 %s389_s28, 4  ;;  %s49_s6 = sshll.u32 %s390_s30, 4  ;;  %s41_s29 = int_to_ptr.vmem [resolvable:$true] %s40_s29  ;;  %s50_s6 = int_to_ptr.vmem [resolvable:$true] %s49_s6 }
  0x19   :  { %s327_s7 = scalar_lea.vmem %s41_s29, 128  ;;  %p332_p11 = scmp.lt.s32.totalorder %s41_s29, %s41_s29 }
  0x1a   :  { %p328_p10 = scmp.ne.s32.totalorder %s41_s29, %s327_s7  ;;  %p333_p12 = scmp.lt.s32.totalorder %s327_s7, %s327_s7 }
  0x1c   :  { %p334_p13 = por %p333_p12, %p332_p11 }
  0x1e   :  { %p335_p0 = pnand %p334_p13, %p328_p10 }
  0x20   :  { %338 = shalt.err (!%p335_p0)
}
  0x21   :  { %43 = dma.hbm_to_vmem [thread:$0]  %s448_s2, 128, %s41_s29, [#allocation7]  }
  0x22   :  { %s347_s9 = scalar_lea.vmem %s50_s6, 1024  ;;  %p352_p2 = scmp.lt.s32.totalorder %s50_s6, %s50_s6 }
  0x23   :  { %p348_p1 = scmp.ne.s32.totalorder %s50_s6, %s347_s9  ;;  %p353_p3 = scmp.lt.s32.totalorder %s347_s9, %s347_s9 }
  0x25   :  { %p354_p4 = por %p353_p3, %p352_p2 }
  0x27   :  { %p355_p5 = pnand %p354_p4, %p348_p1 }
  0x29   :  { %358 = shalt.err (!%p355_p5)
}
  0x2a   :  { %s391_s0 = smov 64   ;;  %s392_s10 = smov 4  }
  0x2b   :  { %55 = dma.hbm_to_vmem [thread:$0]  %s449_s3, 1024, %s50_s6, [#allocation10], %s391_s0, %s391_s0, %s392_s10  }
  0x2c   :  { %379 = dma.done.wait [#allocation4], 128  }
  0x2d   :  { %380 = vsyncadd [#allocation4], 4294967168 }
  0x2e   :  { %381 = dma.done.wait [#allocation7], 256  }
  0x2f   :  { %382 = vsyncadd [#allocation7], 4294967040 }
  0x30   :  { %383 = dma.done.wait [#allocation10], 1024  }
  0x31   :  { %384 = vsyncadd [#allocation10], 4294966272  ;;  %v393_v0 = vmov 0.0   ;;  %vm394_vm0 = vmmov 0   ;;  %v75_v1 = vld [vmem:[#allocation6] sm:$0xff]  ;;  %s395_s2 = smov 32  }
  0x32   :  { %240 = vmatprep.subr.bf16.mxu0 %v393_v0  ;;  %71 = vst [vmem:[#allocation2] sm:$0xff] %v393_v0  ;;  %256 = vmatprep.mubr.msk.bf16.mxu0 %vm394_vm0, %v393_v0  ;;  %v271_v2 = vld [vmem:[#allocation9 + $0x38] sm:$0xff]   ;;  %v272_v4 = vld [vmem:[#allocation9 + $0x30] sm:$0xff]   ;;  %vm73_vm1 = vcmask 261120   ;;  %s396_s3 = smov 48   ;;  %v72_v5 = vld [vmem:[#allocation3] sm:$0xff] }
  0x33   :  { %77 = vrot.lane.b32.xlu0 %v75_v1, %s395_s2  ;;  %v82_v3 = vld [vmem:[#allocation8] sm:$0xff]  ;;  %241 = vmatpush3.bf16.msra.mxu0 %v271_v2  ;;  %74 = vst.msk [vmem:[#allocation2] sm:$0xff] %vm73_vm1, %v72_v5  ;;  %v273_v6 = vld [vmem:[#allocation9 + $0x28] sm:$0xff]   ;;  %v274_v7 = vld [vmem:[#allocation9 + $0x20] sm:$0xff]   ;;  %vm80_vm2 = vcmask 392448   ;;  %vm87_vm3 = vcmask 589184  }
  0x34   :  { %242 = vmatprep.subr.bf16.mxu0 %v393_v0  ;;  %v275_v8 = vld [vmem:[#allocation9 + $0x18] sm:$0xff]   ;;  %v276_v9 = vld [vmem:[#allocation9 + $0x10] sm:$0xff]   ;;  %v277_v10 = vld [vmem:[#allocation9 + $0x8] sm:$0xff]   ;;  %s397_s15 = smov [#allocation11]   ;;  %vm203_vm4 = vcmask 523264  }
  0x35   :  { %v278_v11 = vld [vmem:[#allocation9] sm:$0xff]   ;;  %s211_s16 = sshll.u32 %s397_s15, 4  ;;  %s212_s16 = int_to_ptr.vmem [resolvable:$true] %s211_s16 }
  0x36   :  { %v230_v16 = vld [vmem:[%s450_s4] ss:$0 sm:$0xff]  ;;  %s359_s17 = scalar_lea.vmem %s212_s16, 128  ;;  %p364_p7 = scmp.lt.s32.totalorder %s212_s16, %s212_s16 }
  0x37   :  { %84 = vrot.lane.b32.xlu0 %v82_v3, %s396_s3  ;;  %243 = vmatpush3.bf16.msra.mxu0 %v272_v4  ;;  %p360_p6 = scmp.ne.s32.totalorder %s212_s16, %s359_s17  ;;  %p365_p8 = scmp.lt.s32.totalorder %s359_s17, %s359_s17 }
  0x38   :  { %244 = vmatprep.subr.bf16.mxu0 %v393_v0 }
  0x39   :  { %p366_p9 = por %p365_p8, %p364_p7 }
  0x3b   :  { %245 = vmatpush3.bf16.msra.mxu0 %v273_v6  ;;  %p367_p10 = pnand %p366_p9, %p360_p6 }
  0x3c   :  { %246 = vmatprep.subr.bf16.mxu0 %v393_v0 }
  0x3f   :  { %247 = vmatpush3.bf16.msra.mxu0 %v274_v7 }
  0x40   :  { %248 = vmatprep.subr.bf16.mxu0 %v393_v0 }
  0x43   :  { %249 = vmatpush3.bf16.msra.mxu0 %v275_v8 }
  0x44   :  { %250 = vmatprep.subr.bf16.mxu0 %v393_v0 }
  0x47   :  { %251 = vmatpush3.bf16.msra.mxu0 %v276_v9 }
  0x48   :  { %252 = vmatprep.subr.bf16.mxu0 %v393_v0 }
  0x4b   :  { %253 = vmatpush3.bf16.msra.mxu0 %v277_v10 }
  0x4c   :  { %254 = vmatprep.subr.bf16.mxu0 %v393_v0 }
  0x4f   :  { %255 = vmatpush3.bf16.msra.mxu0 %v278_v11 }
  0xa5   :  { %v78_v12 = vpop.permute.xlu0 %77 }
  0xa6   :  { %81 = vst.msk [vmem:[#allocation2] sm:$0xff] %vm80_vm2, %v78_v12 }
  0xa9   :  { %v85_v13 = vpop.permute.xlu0 %84 }
  0xaa   :  { %88 = vst.msk [vmem:[#allocation2] sm:$0xff] %vm87_vm3, %v85_v13 }
  0xb1   :  { %v89_v14 = vld [vmem:[#allocation2] sm:$0xff] }
  0xb2   :  { %v90_v15 = vpack.c.bf16 %v89_v14, %v89_v14 }
  0xb4   :  { %257 = vmatmul.mubr.bf16.vlgmr.msra.gmra.mxu0 %v90_v15 }
 0x174   :  { %v189_v17 = vpop.f32.mrf.mxu0 }
 0x175   :  { %v202_v18 = vadd.f32 %v230_v16, %v189_v17 }
 0x176   :  { %v258_v19 = vpop.f32.mrf.mxu0 }
 0x177   :  { %204 = vst.msk [vmem:[#allocation11] sm:$0xff] %vm203_vm4, %v202_v18 }
 0x178   :  { %v192_v20 = vpop.f32.mrf.mxu0 }
 0x179   :  { %370 = shalt.err (!%p367_p10)
}
 0x17a   :  { %214 = dma.vmem_to_hbm [thread:$0]  %s212_s16, 128, %s451_s5, [#allocation5]   ;;  %v259_v21 = vpop.f32.mrf.mxu0 }
 0x17b   :  { %385 = dma.done.wait [#allocation5], 128  }
 0x17c   :  { %386 = vsyncadd [#allocation5], 4294967168 }
 0x17d   :  { %218 = vsyncpa [#allocation4], 1 }
 0x17e   :  { %219 = vsyncpa [#allocation7], 1 }
 0x17f   :  { %220 = vsyncpa [#allocation10], 1 }
 0x180   :  { %221 = vsyncpa [#allocation5], 1 }

</bundles_post_ra>
